<compile_context>
chip_gen: v7x
topology: tpu7x:2x2x1
jax: 0.10.0
libtpu: 0.0.40
codegen_flags: <defaults>
</compile_context>

<pallas_src>
import jax
import jax.numpy as jnp
from jax.experimental import pallas as pl
from jax.experimental.pallas import tpu as pltpu

LANES = 128  # vreg lane width


def _round_up(x, m):
    return ((x + m - 1) // m) * m


def _pad_bytes(rows, cols, dtype):
    """Bytes of a VMEM tile after (sublane, 128-lane) padding."""
    itemsize = jnp.dtype(dtype).itemsize
    sub = max(8, 32 // itemsize)  # f32: 8, bf16: 16, i8: 32 sublanes
    return _round_up(max(rows, 1), sub) * _round_up(max(cols, 1), LANES) * itemsize


def _vmem_cap_bytes():
    """~75% of physical VMEM for this generation (conservative fallback: v7x)."""
    try:
        phys = pltpu.get_tpu_info().vmem_capacity_bytes
    except Exception:
        phys = 64 << 20
    return int(phys * 0.75)


# -----------------------------------------------------------------------------
# Kernels
# -----------------------------------------------------------------------------
def _mlp_fused_kernel(x_ref, w1_ref, b1_ref, w2_ref, b2_ref, o_ref):
    """Weight-resident path: whole hidden dim in one shot per batch tile."""
    # [tb, in] @ [in, hidden_pad] -> f32 accumulate on the MXU.
    h = jnp.dot(x_ref[...], w1_ref[...], preferred_element_type=jnp.float32)
    # Bias + tanh in f32 (portable to v5e which has no bf16 VPU/EUP).
    h = jnp.tanh(h + b1_ref[...])
    # Only downcast the activation for low-precision *float* weights.
    # TODO(synk): int8/fp8 weights would need explicit (de)quant scales.
    if jnp.issubdtype(w2_ref.dtype, jnp.floating) and w2_ref.dtype != jnp.float32:
        h = h.astype(w2_ref.dtype)
    y = jnp.dot(h, w2_ref[...], preferred_element_type=jnp.float32)
    # Lane-dense (out_pad multiple of 128) unmasked store.
    o_ref[...] = (y + b2_ref[...]).astype(o_ref.dtype)


def _mlp_hidden_tiled_kernel(x_ref, w1_ref, b1_ref, w2_ref, b2_ref, o_ref, acc_ref):
    """Fallback path: hidden dim tiled as a reduction grid axis (last, arbitrary)."""
    k = pl.program_id(1)

    @pl.when(k == 0)
    def _():
        acc_ref[...] = jnp.zeros_like(acc_ref)

    h = jnp.dot(x_ref[...], w1_ref[...], preferred_element_type=jnp.float32)
    h = jnp.tanh(h + b1_ref[...])
    if jnp.issubdtype(w2_ref.dtype, jnp.floating) and w2_ref.dtype != jnp.float32:
        h = h.astype(w2_ref.dtype)
    acc_ref[...] += jnp.dot(h, w2_ref[...], preferred_element_type=jnp.float32)

    @pl.when(k == pl.num_programs(1) - 1)
    def _():
        o_ref[...] = (acc_ref[...] + b2_ref[...]).astype(o_ref.dtype)


# -----------------------------------------------------------------------------
# Parameter prep (one-time, outside the per-step forward path)
# -----------------------------------------------------------------------------
def prepare_params(w1, b1, w2, b2, *, param_dtype=None):
    """PyTorch nn.Linear layout in: w1 [hidden, in], b1 [hidden], w2 [out, hidden], b2 [out].

    Returns kernel layout: W1^T [in, hidden_pad], b1 [1, hidden_pad] (f32),
    W2^T [hidden_pad, out_pad], b2 [1, out_pad] (f32).  hidden and out are
    zero-padded to multiples of 128 lanes; padding is exact-by-construction
    (tanh(0)=0 and padded W2 rows are zero).  param_dtype (e.g. jnp.bfloat16)
    optionally downcasts the weight matrices to halve resident VMEM.
    """
    w1 = jnp.asarray(w1)
    b1 = jnp.asarray(b1)
    w2 = jnp.asarray(w2)
    b2 = jnp.asarray(b2)
    hidden, in_dim = w1.shape
    out_dim = w2.shape[0]
    hidden_pad = _round_up(hidden, LANES)
    out_pad = _round_up(out_dim, LANES)

    wdt = param_dtype if param_dtype is not None else w1.dtype
    w1_t = jnp.zeros((in_dim, hidden_pad), wdt).at[:, :hidden].set(w1.T.astype(wdt))
    b1_r = jnp.zeros((1, hidden_pad), jnp.float32).at[:, :hidden].set(b1.astype(jnp.float32))
    w2_t = jnp.zeros((hidden_pad, out_pad), wdt).at[:hidden, :out_dim].set(w2.T.astype(wdt))
    b2_r = jnp.zeros((1, out_pad), jnp.float32).at[:, :out_dim].set(b2.astype(jnp.float32))
    return (w1_t, b1_r, w2_t, b2_r), out_dim


# -----------------------------------------------------------------------------
# Forward
# -----------------------------------------------------------------------------
def mlp_forward(x, params, out_dim, *, tile_b=None, tile_h=None,
                force_hidden_tiling=False, return_padded=False, x_buffers=3):
    """x: [B, in]. params: output of prepare_params. Returns [B, out_dim]."""
    w1_t, b1_r, w2_t, b2_r = params
    B, in_dim = x.shape
    hidden_pad = w1_t.shape[1]
    out_pad = w2_t.shape[1]
    xdt = x.dtype
    wdt = w1_t.dtype

    # Batch tile: >=2 grid steps when B > 8 (keeps both v7x TCs busy), multiple
    # of 8 sublanes, capped at 512 so VMEM stays bounded as B grows.
    if tile_b is None:
        tile_b = min(512, _round_up(pl.cdiv(B, 2), 8)) if B > 8 else _round_up(B, 8)
    tile_b = max(8, _round_up(tile_b, 8))
    nb = pl.cdiv(B, tile_b)

    cap = _vmem_cap_bytes()
    xb = max(1, min(x_buffers, nb))  # don't over-buffer a short grid

    # VMEM budget for the weight-resident path ((8,128)-padded tile sizes).
    resident_need = (
        xb * _pad_bytes(tile_b, in_dim, xdt)            # streamed x tiles
        + 2 * _pad_bytes(tile_b, out_pad, xdt)          # streamed out tiles
        + _pad_bytes(in_dim, hidden_pad, wdt)           # W1 (single buffered)
        + _pad_bytes(1, hidden_pad, jnp.float32)        # b1
        + _pad_bytes(hidden_pad, out_pad, wdt)          # W2
        + _pad_bytes(1, out_pad, jnp.float32)           # b2
    )

    cost = pl.CostEstimate(
        flops=2 * B * hidden_pad * (in_dim + out_pad),
        transcendentals=B * hidden_pad,
        bytes_accessed=(x.size * x.dtype.itemsize
                        + sum(int(p.size) * p.dtype.itemsize for p in params)
                        + B * out_pad * x.dtype.itemsize),
    )

    resident = dict(pipeline_mode=pl.Buffered(1))  # constant block index -> 1 buffer

    if not force_hidden_tiling and resident_need <= int(cap * 0.9):
        # ----- weight-resident fused path -----
        vmem_limit = min(max(int(resident_need * 1.25) + (2 << 20), 16 << 20), cap)
        y_pad = pl.pallas_call(
            _mlp_fused_kernel,
            out_shape=jax.ShapeDtypeStruct((B, out_pad), xdt),
            grid_spec=pltpu.PrefetchScalarGridSpec(
                num_scalar_prefetch=0,
                grid=(nb,),
                in_specs=[
                    pl.BlockSpec((tile_b, in_dim), lambda i: (i, 0),
                                 pipeline_mode=pl.Buffered(xb)),               # x (streamed)
                    pl.BlockSpec((in_dim, hidden_pad), lambda i: (0, 0), **resident),  # W1
                    pl.BlockSpec((1, hidden_pad), lambda i: (0, 0), **resident),       # b1
                    pl.BlockSpec((hidden_pad, out_pad), lambda i: (0, 0), **resident), # W2
                    pl.BlockSpec((1, out_pad), lambda i: (0, 0), **resident),          # b2
                ],
                out_specs=pl.BlockSpec((tile_b, out_pad), lambda i: (i, 0)),
            ),
            compiler_params=pltpu.CompilerParams(
                dimension_semantics=("parallel",),
                vmem_limit_bytes=int(vmem_limit),
            ),
            cost_estimate=cost,
        )(x, w1_t, b1_r, w2_t, b2_r)
    else:
        # ----- hidden-tiled fallback (weights too big to stay resident) -----
        def tiled_need(th):
            return (
                2 * _pad_bytes(tile_b, in_dim, xdt)
                + 2 * _pad_bytes(in_dim, th, wdt)
                + 2 * _pad_bytes(1, th, jnp.float32)
                + 2 * _pad_bytes(th, out_pad, wdt)
                + _pad_bytes(1, out_pad, jnp.float32)
                + 2 * _pad_bytes(tile_b, out_pad, xdt)
                + _pad_bytes(tile_b, out_pad, jnp.float32)  # accumulator scratch
            )

        if tile_h is None:
            tile_h, need = None, None
            fallback_h = fallback_need = None
            for cand in (2048, 1024, 512, 256, 128):
                if hidden_pad % cand:
                    continue
                n = tiled_need(cand)
                fallback_h, fallback_need = cand, n
                if n <= int(cap * 0.9):
                    tile_h, need = cand, n
                    break
            if tile_h is None:  # nothing fit comfortably; take smallest divisor
                tile_h, need = fallback_h, fallback_need
        else:
            assert tile_h % LANES == 0 and hidden_pad % tile_h == 0
            need = tiled_need(tile_h)

        nk = hidden_pad // tile_h
        vmem_limit = min(max(int(need * 1.25) + (2 << 20), 16 << 20), cap)
        y_pad = pl.pallas_call(
            _mlp_hidden_tiled_kernel,
            out_shape=jax.ShapeDtypeStruct((B, out_pad), xdt),
            grid_spec=pltpu.PrefetchScalarGridSpec(
                num_scalar_prefetch=0,
                grid=(nb, nk),
                in_specs=[
                    pl.BlockSpec((tile_b, in_dim), lambda i, k: (i, 0)),        # x
                    pl.BlockSpec((in_dim, tile_h), lambda i, k: (0, k)),        # W1 tile
                    pl.BlockSpec((1, tile_h), lambda i, k: (0, k)),             # b1 tile
                    pl.BlockSpec((tile_h, out_pad), lambda i, k: (k, 0)),       # W2 tile
                    pl.BlockSpec((1, out_pad), lambda i, k: (0, 0), **resident),# b2
                ],
                out_specs=pl.BlockSpec((tile_b, out_pad), lambda i, k: (i, 0)),
                scratch_shapes=[pltpu.VMEM((tile_b, out_pad), jnp.float32)],
            ),
            compiler_params=pltpu.CompilerParams(
                dimension_semantics=("parallel", "arbitrary"),
                vmem_limit_bytes=int(vmem_limit),
            ),
            cost_estimate=cost,
        )(x, w1_t, b1_r, w2_t, b2_r)

    if return_padded:
        return y_pad
    # NOTE: separate XLA slice pass; for tiny out_dim at huge B consider
    # consuming the padded slab directly (return_padded=True).
    return y_pad[:, :out_dim]


# -----------------------------------------------------------------------------
if __name__ == "__main__":
    # Shapes consistent with the module: input=32, hidden=64, output=16, batch=32.
    batch, input_size, hidden_size, output_size = 32, 32, 64, 16

    key = jax.random.PRNGKey(0)
    kx, kw1, kb1, kw2, kb2 = jax.random.split(key, 5)

    # PyTorch nn.Linear layout: weight [out, in], bias [out].
    x = jax.random.normal(kx, (batch, input_size), dtype=jnp.float32)
    w1 = jax.random.normal(kw1, (hidden_size, input_size), dtype=jnp.float32) * 0.1
    b1 = jax.random.normal(kb1, (hidden_size,), dtype=jnp.float32) * 0.1
    w2 = jax.random.normal(kw2, (output_size, hidden_size), dtype=jnp.float32) * 0.1
    b2 = jax.random.normal(kb2, (output_size,), dtype=jnp.float32) * 0.1

    params, out_dim = prepare_params(w1, b1, w2, b2)
    params = jax.block_until_ready(params)

    ref = jnp.tanh(x @ w1.T + b1) @ w2.T + b2

    # 1) Weight-resident fused path (auto-selected for these shapes).
    out = jax.block_until_ready(mlp_forward(x, params, out_dim))
    assert out.shape == (batch, output_size)
    assert jnp.allclose(out, ref, atol=1e-5, rtol=1e-5)

    # 2) Hidden-tiled fallback path (used when weights exceed the VMEM budget,
    #    e.g. large hidden/out on v7x).  Use hidden=256 with tile_h=128 so the
    #    reduction axis really has 2 steps and the accumulator path is exercised.
    hidden_big = 256
    kw1b, kb1b, kw2b, kb2b = jax.random.split(jax.random.PRNGKey(1), 4)
    w1b = jax.random.normal(kw1b, (hidden_big, input_size), dtype=jnp.float32) * 0.1
    b1b = jax.random.normal(kb1b, (hidden_big,), dtype=jnp.float32) * 0.1
    w2b = jax.random.normal(kw2b, (output_size, hidden_big), dtype=jnp.float32) * 0.1
    b2b = jax.random.normal(kb2b, (output_size,), dtype=jnp.float32) * 0.1
    params_b, out_dim_b = prepare_params(w1b, b1b, w2b, b2b)
    refb = jnp.tanh(x @ w1b.T + b1b) @ w2b.T + b2b
    out_b = jax.block_until_ready(
        mlp_forward(x, params_b, out_dim_b, force_hidden_tiling=True, tile_h=128))
    assert out_b.shape == (batch, output_size)
    assert jnp.allclose(out_b, refb, atol=1e-4, rtol=1e-4)

    print("KERNEL_OK")
</pallas_src>

<mosaic_0001>
module attributes {stable_mosaic.version = 11 : i64} {
  func.func @_mlp_fused_kernel(%arg0: i32, %arg1: memref<16x32xf32, #tpu.memory_space<vmem>>, %arg2: memref<32x128xf32, #tpu.memory_space<vmem>>, %arg3: memref<1x128xf32, #tpu.memory_space<vmem>>, %arg4: memref<128x128xf32, #tpu.memory_space<vmem>>, %arg5: memref<1x128xf32, #tpu.memory_space<vmem>>, %arg6: memref<16x128xf32, #tpu.memory_space<vmem>>) attributes {dimension_semantics = [#tpu.dimension_semantics<parallel>], iteration_bounds = array<i64: 2>, scalar_prefetch = 0 : i64, scratch_operands = 0 : i64, tpu.core_type = #tpu.core_type<tc>, window_params = [{pipeline_mode = #tpu.pipeline_mode<double_buffered>, transform_indices = @transform_0, window_bounds = array<i64: 16, 32>}, {pipeline_mode = #tpu.pipeline_mode<synchronous>, transform_indices = @transform_1, window_bounds = array<i64: 32, 128>}, {pipeline_mode = #tpu.pipeline_mode<synchronous>, transform_indices = @transform_2, window_bounds = array<i64: 1, 128>}, {pipeline_mode = #tpu.pipeline_mode<synchronous>, transform_indices = @transform_3, window_bounds = array<i64: 128, 128>}, {pipeline_mode = #tpu.pipeline_mode<synchronous>, transform_indices = @transform_4, window_bounds = array<i64: 1, 128>}, {transform_indices = @transform_5, window_bounds = array<i64: 16, 128>}]} {
    %c0 = arith.constant 0 : index
    %c0_0 = arith.constant 0 : index
    %0 = vector.load %arg1[%c0, %c0_0] : memref<16x32xf32, #tpu.memory_space<vmem>>, vector<16x32xf32>
    %c0_1 = arith.constant 0 : index
    %c0_2 = arith.constant 0 : index
    %1 = vector.load %arg2[%c0_1, %c0_2] : memref<32x128xf32, #tpu.memory_space<vmem>>, vector<32x128xf32>
    %cst = arith.constant dense<0.000000e+00> : vector<16x128xf32>
    %2 = tpu.matmul %0, %1, %cst {dimension_numbers = #tpu.dot_dimension_numbers<[1], [0], [0], [1], [0, 0, 1, 1], [], []>} : vector<16x32xf32>, vector<32x128xf32>, vector<16x128xf32> -> vector<16x128xf32>
    %c0_3 = arith.constant 0 : index
    %c0_4 = arith.constant 0 : index
    %3 = vector.load %arg3[%c0_3, %c0_4] : memref<1x128xf32, #tpu.memory_space<vmem>>, vector<1x128xf32>
    %4 = vector.broadcast %3 : vector<1x128xf32> to vector<16x128xf32>
    %5 = arith.addf %2, %4 : vector<16x128xf32>
    %6 = math.tanh %5 : vector<16x128xf32>
    %c0_5 = arith.constant 0 : index
    %c0_6 = arith.constant 0 : index
    %7 = vector.load %arg4[%c0_5, %c0_6] : memref<128x128xf32, #tpu.memory_space<vmem>>, vector<128x128xf32>
    %cst_7 = arith.constant dense<0.000000e+00> : vector<16x128xf32>
    %8 = tpu.matmul %6, %7, %cst_7 {dimension_numbers = #tpu.dot_dimension_numbers<[1], [0], [0], [1], [0, 0, 1, 1], [], []>} : vector<16x128xf32>, vector<128x128xf32>, vector<16x128xf32> -> vector<16x128xf32>
    %c0_8 = arith.constant 0 : index
    %c0_9 = arith.constant 0 : index
    %9 = vector.load %arg5[%c0_8, %c0_9] : memref<1x128xf32, #tpu.memory_space<vmem>>, vector<1x128xf32>
    %10 = vector.broadcast %9 : vector<1x128xf32> to vector<16x128xf32>
    %11 = arith.addf %8, %10 : vector<16x128xf32>
    %c0_10 = arith.constant 0 : index
    %c0_11 = arith.constant 0 : index
    %12 = vector.load %arg6[%c0_10, %c0_11] : memref<16x128xf32, #tpu.memory_space<vmem>>, vector<16x128xf32>
    tpu.vector_store %arg6[%c0_10, %c0_11], %11 {strides = array<i32>} : memref<16x128xf32, #tpu.memory_space<vmem>>, vector<16x128xf32>,
    return
  }
  func.func @transform_0(%arg0: i32) -> (i32, i32) {
    %c0_i32 = arith.constant 0 : i32
    %c0_i32_0 = arith.constant 0 : i32
    return %arg0, %c0_i32 : i32, i32
  }
  func.func @transform_1(%arg0: i32) -> (i32, i32) {
    %c0_i32 = arith.constant 0 : i32
    %c0_i32_0 = arith.constant 0 : i32
    %c0_i32_1 = arith.constant 0 : i32
    return %c0_i32, %c0_i32_0 : i32, i32
  }
  func.func @transform_2(%arg0: i32) -> (i32, i32) {
    %c0_i32 = arith.constant 0 : i32
    %c0_i32_0 = arith.constant 0 : i32
    %c0_i32_1 = arith.constant 0 : i32
    return %c0_i32, %c0_i32_0 : i32, i32
  }
  func.func @transform_3(%arg0: i32) -> (i32, i32) {
    %c0_i32 = arith.constant 0 : i32
    %c0_i32_0 = arith.constant 0 : i32
    %c0_i32_1 = arith.constant 0 : i32
    return %c0_i32, %c0_i32_0 : i32, i32
  }
  func.func @transform_4(%arg0: i32) -> (i32, i32) {
    %c0_i32 = arith.constant 0 : i32
    %c0_i32_0 = arith.constant 0 : i32
    %c0_i32_1 = arith.constant 0 : i32
    return %c0_i32, %c0_i32_0 : i32, i32
  }
  func.func @transform_5(%arg0: i32) -> (i32, i32) {
    %c0_i32 = arith.constant 0 : i32
    %c0_i32_0 = arith.constant 0 : i32
    return %arg0, %c0_i32 : i32, i32
  }
}

</mosaic_0001>

<bundles_post_ra>
// kernel: tpu_custom_call.1
= control target key start
LH: loop header
LB: loop body
LE: loop exit
PB: predicated region body
PF: predicated region fallthrough
CT: control target
= control target key end

     0   :  { %10 = vsyncpa [#allocation3], 0  ;;  %s1237_s0 = inlined_call_operand.hbm [shape: f32[32,32], index: 0, kind: input, shape index: {}]   ;;  %s1238_s1 = inlined_call_operand.hbm [shape: f32[32,128], index: 1, kind: input, shape index: {}]   ;;  %s1239_s2 = inlined_call_operand.vmem [shape: f32[1,128], index: 2, kind: input, shape index: {}]   ;;  %s1240_s3 = inlined_call_operand.hbm [shape: f32[128,128], index: 3, kind: input, shape index: {}]   ;;  %s1241_s4 = inlined_call_operand.vmem [shape: f32[1,128], index: 4, kind: input, shape index: {}]   ;;  %s1242_s5 = inlined_call_operand.hbm [shape: f32[32,128], index: 5, kind: output, shape index: {}]  }
   0x1   :  { %12 = vsyncpa [#allocation3 + $0x1], 0 }
   0x2   :  { %13 = vsyncpa [#allocation6], 0 }
   0x3   :  { %14 = vsyncpa [#allocation4], 0 }
   0x4   :  { %16 = vsyncpa [#allocation4 + $0x1], 0  ;;  %s982_s18 = smov 0   ;;  %s984_s19 = smov 0  }
   0x5   :  { %s986_s20 = smov 0   ;;  %s988_s21 = smov 0  }
   0x6 LB: > { %s1003_s22 = sadd.s32 4294967295, %s942_s21   ;;  %s577_s23 = sadd.s32 4294967294, %s942_s21   ;;  %s942_s21 = sphi %s988_s21, %s1262_s21   ;;  %s938_s20 = sphi %s986_s20, %s1261_s20   ;;  %s934_s19 = sphi %s984_s19, %s1260_s19   ;;  %s930_s18 = sphi %s982_s18, %s1259_s18  }
   0x7   : > { %p42_p0 = scmp.ne.s32.totalorder %s934_s19, %s930_s18  ;;  %p1243_p1 = scmp.eq.s32.totalorder %s1003_s22, 0 }
   0x8   : > { %p156_p3 = scmp.eq.s32.totalorder %s577_s23, 1  ;;  %p578_p5 = scmp.ge.s32.totalorder %s942_s21, 1 }
   0x9   : > { %p1012_p4 = por %p1243_p1, %p42_p0  ;;  %p163_p7 = scmp.lt.s32.totalorder %s942_s21, 3 }
   0xa   : > { %p1017_p6 = por %p156_p3, %p42_p0  ;;  %s944_s27 = smov [#allocation5]  }
   0xb   : > { %s1246_s24 = scalar_select %p1012_p4, 1, 0 }
   0xc   : > { %s1247_s25 = scalar_select %p1017_p6, 1, 0 }
   0xd   : > { %p1022_p8 = pnand %p578_p5, %p163_p7  ;;  %s175_s28 = sshll.u32 %s944_s27, 4  ;;  %s1026_s28 = int_to_ptr.vmem [resolvable:$true] %s175_s28 }
   0xe   : > { %s945_s30 = smov [#allocation7]   ;;  %s786_s9 = scalar_lea.hbm %s1238_s1, 512 }
   0xf   : > { %p723_p9 = pneg %p1022_p8  ;;  %s191_s6 = sshll.u32 %s945_s30, 4  ;;  %s1037_s6 = int_to_ptr.vmem [resolvable:$true] %s191_s6 }
  0x10   : > { %p787_p12 = scmp.ne.s32.totalorder %s1238_s1, %s786_s9  ;;  %p793_p5 = scmp.lt.u32.totalorder %s786_s9, %s1238_s1 }
  0x11   : > { %p1033_p11 = pnand %p723_p9, %p1243_p1 }
  0x13   : > { %p788_p13 = pneg %p1033_p11 }
  0x15   : > { %p789_p0 = pnand %p788_p13, %p787_p12 }
  0x17   : > { %p790_p3 = pneg %p789_p0 }
  0x19   : > { %p795_p7 = pnand %p793_p5, %p790_p3 }
  0x1b   : > { %798 = shalt.err (!%p795_p7)
}
  0x1c   : > { %s799_s14 = scalar_lea.vmem %s1026_s28, 512  ;;  %p807_p2 = scmp.lt.s32.totalorder %s1026_s28, %s1026_s28 }
  0x1d   : > { %p800_p9 = scmp.ne.s32.totalorder %s1026_s28, %s799_s14  ;;  %p808_p12 = scmp.lt.s32.totalorder %s799_s14, %s799_s14 }
  0x1f   : > { %p802_p10 = pnand %p800_p9, %p788_p13  ;;  %p809_p0 = por %p808_p12, %p807_p2 }
  0x21   : > { %p803_p1 = pneg %p802_p10 }
  0x23   : > { %p810_p6 = pnand %p809_p0, %p803_p1 }
  0x25   : > { %813 = shalt.err (!%p810_p6)
}
  0x26   : > { %s946_s15 = smov 128   ;;  %s947_s16 = smov 8  }
  0x27   : > { %726 = dma.hbm_to_vmem [thread:$0]  (!%p1033_p11), %s1238_s1, 512, %s1026_s28, [#allocation6], %s946_s15, %s946_s15, %s947_s16  }
  0x28   : > { %s814_s7 = scalar_lea.hbm %s1240_s3, 2048 }
  0x29   : > { %p815_p1 = scmp.ne.s32.totalorder %s1240_s3, %s814_s7  ;;  %p821_p10 = scmp.lt.u32.totalorder %s814_s7, %s1240_s3 }
  0x2b   : > { %p817_p2 = pnand %p815_p1, %p788_p13 }
  0x2d   : > { %p818_p6 = pneg %p817_p2 }
  0x2f   : > { %p823_p3 = pnand %p821_p10, %p818_p6 }
  0x31   : > { %826 = shalt.err (!%p823_p3)
}
  0x32   : > { %s827_s28 = scalar_lea.vmem %s1037_s6, 2048  ;;  %p835_p12 = scmp.lt.s32.totalorder %s1037_s6, %s1037_s6 }
  0x33   : > { %p828_p5 = scmp.ne.s32.totalorder %s1037_s6, %s827_s28  ;;  %p836_p0 = scmp.lt.s32.totalorder %s827_s28, %s827_s28 }
  0x35   : > { %p830_p7 = pnand %p828_p5, %p788_p13  ;;  %p837_p1 = por %p836_p0, %p835_p12 }
  0x37   : > { %p831_p9 = pneg %p830_p7 }
  0x39   : > { %p838_p2 = pnand %p837_p1, %p831_p9 }
  0x3b   : > { %841 = shalt.err (!%p838_p2)
}
  0x3c   : > { %729 = dma.hbm_to_vmem [thread:$0]  (!%p1033_p11), %s1240_s3, 2048, %s1037_s6, [#allocation6], %s946_s15, %s946_s15, %s947_s16  }
  0x3d   : > { %s1098_s29 = sadd.s32 1, %s942_s21   ;;  %s29_s14 = sadd.s32 1, %s938_s20 }
  0x3e   : > { %s26_s17 = ssub.s32 %s942_s21, %s1098_s29  ;;  %p36_p13 = scmp.ne.s32.totalorder %s938_s20, %s934_s19 }
  0x3f   : > { %p27_p6 = scmp.eq.s32.totalorder %s26_s17, 0  ;;  %p37_p10 = scmp.eq.s32.totalorder %s942_s21, 0 }
  0x40   : > { %p1250_p3 = scmp.eq.s32.totalorder %s1003_s22, 1  ;;  %p740_p7 = scmp.lt.s32.totalorder %s942_s21, 2 }
  0x41   : > { %s1114_s27 = scalar_select %p27_p6, %s938_s20, %s29_s14  }
  0x42   : > { %p1108_p5 = por %p1250_p3, %p36_p13  ;;  %p38_p9 = por %p37_p10, %p36_p13 }
  0x43   : > { %s208_s30 = sand.u32 1, %s938_s20   ;;  %s599_s6 = sshll.u32 %s942_s21, 8 }
  0x44   : > { %s1251_s23 = scalar_select %p1108_p5, 1, 0 }
  0x45   : > { %s582_s7 = sshll.u32 %s208_s30, 4  ;;  %s1121_s10 = scalar_lea.hbm %s1237_s0, %s599_s6 }
  0x46   : > { %s212_s11 = scalar_lea.vmem [#allocation2], %s582_s7  ;;  %p1125_p11 = pnand %p740_p7, %p38_p9 }
  0x47   : > { %s219_s28 = sshll.u32 %s212_s11, 4  ;;  %s1129_s13 = scalar_lea.sflag [#allocation3], %s208_s30  ;;  %s1123_s28 = int_to_ptr.vmem [resolvable:$true] %s219_s28 }
  0x48   : > { %s842_s14 = scalar_lea.hbm %s1121_s10, 256  ;;  %p844_p0 = pneg %p1125_p11 }
  0x49   : > { %p843_p12 = scmp.ne.s32.totalorder %s1121_s10, %s842_s14  ;;  %s847_s6 = scalar_lea.hbm %s1237_s0, 512 }
  0x4a   : > { %p848_p13 = scmp.lt.u32.totalorder %s1121_s10, %s1237_s0  ;;  %p849_p6 = scmp.lt.u32.totalorder %s847_s6, %s842_s14 }
  0x4b   : > { %p845_p1 = pnand %p844_p0, %p843_p12  ;;  %p851_p3 = scmp.lt.u32.totalorder %s842_s14, %s1121_s10 }
  0x4c   : > { %p850_p10 = por %p849_p6, %p848_p13 }
  0x4d   : > { %p846_p2 = pneg %p845_p1 }
  0x4e   : > { %p852_p7 = por %p851_p3, %p850_p10 }
  0x50   : > { %p853_p9 = pnand %p852_p7, %p846_p2 }
  0x52   : > { %856 = shalt.err (!%p853_p9)
}
  0x53   : > { %s857_s30 = scalar_lea.vmem %s1123_s28, 256  ;;  %s948_s11 = smov [#allocation2]  }
  0x54   : > { %p858_p12 = scmp.ne.s32.totalorder %s1123_s28, %s857_s30  ;;  %s862_s17 = sshll.u32 %s948_s11, 4  ;;  %s863_s17 = int_to_ptr.vmem [resolvable:$false] %s862_s17 }
  0x55   : > { %s864_s7 = scalar_lea.vmem %s863_s17, 512  ;;  %p865_p4 = scmp.lt.s32.totalorder %s1123_s28, %s863_s17 }
  0x56   : > { %p860_p1 = pnand %p858_p12, %p844_p0  ;;  %p866_p13 = scmp.lt.s32.totalorder %s864_s7, %s857_s30 }
  0x58   : > { %p861_p5 = pneg %p860_p1  ;;  %p867_p6 = por %p866_p13, %p865_p4 }
  0x5a   : > { %p868_p10 = pnand %p867_p6, %p861_p5 }
  0x5c   : > { %871 = shalt.err (!%p868_p10)
}
  0x5d   : > { %733 = dma.hbm_to_vmem [thread:$0]  (!%p1125_p11), %s1121_s10, 256, %s1123_s28, %s1129_s13, %s946_s15, %s946_s15, %s947_s16  }
  0x5e   : > { %231 = sbr.rel (%p1022_p8) target bundleno = 573 (0x23d), region = 40  ;;  %s1163_s14 = sand.u32 (!%p1022_p8), 1, %s934_s19  }
  0x5f   : > { %s586_s6 = sshll.u32 (!%p1022_p8), %s1163_s14, 4  ;;  %s234_s8 = scalar_lea.sflag (!%p1022_p8), [#allocation3], %s1163_s14 }
  0x60   : > { %s237_s12 = scalar_lea.vmem (!%p1022_p8), [#allocation2], %s586_s6  ;;  %p1253_p4 = scmp.ne.s32.totalorder (!%p1022_p8), %s1246_s24, 0 }
  0x65   : > { %917 = dma.done.wait (%p1253_p4), %s234_s8, 256  }
  0x66   : > { %919 = vsyncadd (%p1253_p4), %s234_s8, 4294967040  ;;  %p1254_p5 = scmp.eq.s32.totalorder %s1003_s22, 0 }
  0x68   : > { %921 = dma.done.wait (%p1254_p5), [#allocation6], 2560   ;;  %p1255_p8 = pmov %p1254_p5 }
  0x69   : > { %vm287_vm0 = vcmask 261120   ;;  %v276_v0 = vld [vmem:[#allocation5] sm:$0xff]  ;;  %v277_v1 = vld [vmem:[#allocation5 + $0x8] sm:$0xff]  ;;  %v278_v2 = vld [vmem:[#allocation5 + $0x10] sm:$0xff]  ;;  %s271_s15 = scalar_lea.vmem [#allocation8], %s586_s6  ;;  %s600_s13 = sshll.u32 %s1003_s22, 8 }
  0x6a   : > { %923 = vsyncadd (%p1255_p8), [#allocation6], 4294964736  ;;  %v671_v3 = vpack.c.bf16 %v277_v1, %v276_v0  ;;  %v279_v4 = vld [vmem:[#allocation5 + $0x18] sm:$0xff]  ;;  %v274_v5 = vld [vmem:[%s237_s12] sm:$0xff]  ;;  %s485_s16 = sshll.u32 %s271_s15, 4  ;;  %s1193_s11 = scalar_lea.hbm %s1242_s5, %s600_s13  ;;  %s1188_s16 = int_to_ptr.vmem [resolvable:$true] %s485_s16 }
  0x6b   : > { %v675_v6 = vpack.c.bf16 %v279_v4, %v278_v2  ;;  %633 = vmatprep.mubr.msk.f32.mxu0 %vm287_vm0, %v274_v5  ;;  %v371_v7 = vld [vmem:[#allocation7] sm:$0xff]  ;;  %v372_v8 = vld [vmem:[#allocation7 + $0x8] sm:$0xff]  ;;  %v373_v9 = vld [vmem:[#allocation7 + $0x10] sm:$0xff]  ;;  %s472_s17 = scalar_lea.sflag [#allocation4], %s1163_s14  ;;  %s872_s7 = scalar_lea.vmem %s1188_s16, 256 }
  0x6c   : > { %672 = vmatprep.subr.bf16.mxu0 %v671_v3  ;;  %v679_v10 = vpack.c.bf16 %v372_v8, %v371_v7  ;;  %v374_v11 = vld [vmem:[#allocation7 + $0x18] sm:$0xff]  ;;  %v375_v13 = vld [vmem:[#allocation7 + $0x20] sm:$0xff]  ;;  %v376_v14 = vld [vmem:[#allocation7 + $0x28] sm:$0xff]  ;;  %p873_p11 = scmp.ne.s32.totalorder %s1188_s16, %s872_s7  ;;  %p1256_p0 = scmp.ne.s32.totalorder %s1251_s23, 0 }
  0x6d   : > { %674 = vmatpush3.bf16.msra.mxu0 %v671_v3  ;;  %v683_v12 = vpack.c.bf16 %v374_v11, %v373_v9  ;;  %v687_v15 = vpack.c.bf16 %v376_v14, %v375_v13  ;;  %v275_v16 = vld [vmem:[%s237_s12 + $0x8] sm:$0xff]  ;;  %v377_v17 = vld [vmem:[#allocation7 + $0x30] sm:$0xff]  ;;  %v379_v20 = vld [vmem:[#allocation7 + $0x40] sm:$0xff]  ;;  %s949_s22 = smov [#allocation8]  }
  0x6e   : > { %676 = vmatprep.subr.bf16.mxu0 %v675_v6  ;;  %680 = vmatprep.subr.bf16.mxu1 %v679_v10  ;;  %v378_v18 = vld [vmem:[#allocation7 + $0x38] sm:$0xff]  ;;  %v380_v21 = vld [vmem:[#allocation7 + $0x48] sm:$0xff]  ;;  %v381_v23 = vld [vmem:[#allocation7 + $0x50] sm:$0xff]  ;;  %p874_p2 = pnand %p873_p11, %p1256_p0  ;;  %s876_s6 = sshll.u32 %s949_s22, 4  ;;  %s877_s6 = int_to_ptr.vmem [resolvable:$false] %s876_s6 }
  0x6f   : > { %682 = vmatpush3.bf16.msra.mxu1 %v679_v10  ;;  %v691_v19 = vpack.c.bf16 %v378_v18, %v377_v17  ;;  %v695_v22 = vpack.c.bf16 %v380_v21, %v379_v20  ;;  %v382_v24 = vld [vmem:[#allocation7 + $0x58] sm:$0xff]  ;;  %v383_v26 = vld [vmem:[#allocation7 + $0x60] sm:$0xff]  ;;  %v384_v27 = vld [vmem:[#allocation7 + $0x68] sm:$0xff]  ;;  %s878_s8 = scalar_lea.vmem %s877_s6, 512  ;;  %p879_p7 = scmp.lt.s32.totalorder %s1188_s16, %s877_s6 }
  0x70   : > { %684 = vmatprep.subr.bf16.mxu1 %v683_v12  ;;  %v699_v25 = vpack.c.bf16 %v382_v24, %v381_v23  ;;  %v385_v28 = vld [vmem:[#allocation7 + $0x70] sm:$0xff]  ;;  %v703_v29 = vpack.c.bf16 %v384_v27, %v383_v26  ;;  %v386_v30 = vld [vmem:[#allocation7 + $0x78] sm:$0xff]  ;;  %v590_v32 = vld [vmem:[%s1239_s2] ss:$0 sm:$0xff]  ;;  %p875_p3 = pneg %p874_p2  ;;  %p880_p9 = scmp.lt.s32.totalorder %s878_s8, %s872_s7 }
  0x71   : > { %678 = vmatpush3.bf16.msra.mxu0 %v675_v6  ;;  %v707_v31 = vpack.c.bf16 %v386_v30, %v385_v28  ;;  %v593_v39 = vld [vmem:[%s1241_s4] ss:$0 sm:$0xff] }
  0x72   : > { %p881_p12 = por %p880_p9, %p879_p7 }
  0x73   : > { %686 = vmatpush3.bf16.msra.mxu1 %v683_v12 }
  0x74   : > { %634 = vmatmul.mubr.msk.f32.vlgmr.msra.gmra.mrb[0].mxu0 %vm287_vm0, %v275_v16  ;;  %688 = vmatprep.subr.bf16.mxu1 %v687_v15  ;;  %p882_p1 = pnand %p881_p12, %p875_p3 }
  0x77   : > { %690 = vmatpush3.bf16.msra.mxu1 %v687_v15 }
  0x78   : > { %692 = vmatprep.subr.bf16.mxu1 %v691_v19 }
  0x7b   : > { %694 = vmatpush3.bf16.msra.mxu1 %v691_v19 }
  0x7c   : > { %696 = vmatprep.subr.bf16.mxu1 %v695_v22 }
  0x7f   : > { %698 = vmatpush3.bf16.msra.mxu1 %v695_v22 }
  0x80   : > { %700 = vmatprep.subr.bf16.mxu1 %v699_v25 }
  0x83   : > { %702 = vmatpush3.bf16.msra.mxu1 %v699_v25 }
  0x84   : > { %704 = vmatprep.subr.bf16.mxu1 %v703_v29 }
  0x87   : > { %706 = vmatpush3.bf16.msra.mxu1 %v703_v29 }
  0x88   : > { %708 = vmatprep.subr.bf16.mxu1 %v707_v31 }
  0x8b   : > { %710 = vmatpush3.bf16.msra.mxu1 %v707_v31 }
 0x147   : > { %v635_v33 = vpop.f32.mrb[0].mxu0 }
 0x148   : > { %v366_v34 = vadd.f32 %v635_v33, %v590_v32  ;;  %v360_v35 = vpop.f32.mrb[1].mxu0 }
 0x149   : > { %v361_v36 = vadd.f32 %v590_v32, %v360_v35 }
 0x14b   : > { %782 = vtanh.f32 %v361_v36 }
 0x14c   : > { %784 = vtanh.f32 %v366_v34 }
 0x155   : > { %v783_v37 = vpop.eup %782 }
 0x156   : > { %v785_v38 = vpop.eup %784  ;;  %668 = vmatprep.mubr.f32.mxu1 %v783_v37 }
 0x157   : > { %669 = vmatmul.mubr.f32.vlgmr.msra.gmra.mrb[0].mxu1 %v785_v38 }
 0x22a   : > { %v670_v40 = vpop.f32.mrb[0].mxu1 }
 0x22b   : > { %v466_v41 = vadd.f32 %v670_v40, %v593_v39  ;;  %v460_v42 = vpop.f32.mrb[1].mxu1 }
 0x22c   : > { %v461_v43 = vadd.f32 %v593_v39, %v460_v42 }
 0x22d   : > { %470 = vst [vmem:[%s271_s15 + $0x8] sm:$0xff] %v466_v41 }
 0x22e   : > { %469 = vst [vmem:[%s271_s15] sm:$0xff] %v461_v43 }
 0x22f   : > { %885 = shalt.err (!%p882_p1)
}
 0x230   : > { %s886_s12 = scalar_lea.hbm %s1193_s11, 256  ;;  %s890_s15 = scalar_lea.hbm %s1242_s5, 512 }
 0x231   : > { %p887_p13 = scmp.ne.s32.totalorder %s1193_s11, %s886_s12  ;;  %p891_p4 = scmp.lt.u32.totalorder %s1193_s11, %s1242_s5 }
 0x232   : > { %p892_p5 = scmp.lt.u32.totalorder %s890_s15, %s886_s12  ;;  %p894_p11 = scmp.lt.u32.totalorder %s886_s12, %s1193_s11 }
 0x233   : > { %p888_p6 = pnand %p887_p13, %p1256_p0 }
 0x234   : > { %p893_p8 = por %p892_p5, %p891_p4 }
 0x235   : > { %p889_p10 = pneg %p888_p6 }
 0x236   : > { %p895_p2 = por %p894_p11, %p893_p8 }
 0x238   : > { %p896_p3 = pnand %p895_p2, %p889_p10 }
 0x23a   : > { %899 = shalt.err (!%p896_p3)
}
 0x23b   : > { %s950_s13 = smov 128   ;;  %s951_s9 = smov 8  }
 0x23c   : > { %721 = dma.vmem_to_hbm [thread:$0]  (%p1256_p0), %s1188_s16, 256, %s1193_s11, %s472_s17, %s950_s13, %s950_s13, %s951_s9  }
 0x23d PF: > { %s500_s30 = sand.u32 1, %s930_s18   ;;  %p1257_p7 = scmp.ne.s32.totalorder %s1247_s25, 0 }
 0x23e   : > { %p1258_p9 = scmp.ge.s32.totalorder %s942_s21, 2  ;;  %s501_s7 = scalar_lea.sflag [#allocation4], %s500_s30 }
 0x240   : > { %p735_p12 = pnand %p1258_p9, %p1257_p7 }
 0x242   : > { %925 = dma.done.wait (!%p735_p12), %s501_s7, 256  }
 0x243   : > { %927 = vsyncadd (!%p735_p12), %s501_s7, 4294967040  ;;  %p19_p1 = scmp.ge.s32.totalorder %s1098_s29, 4   ;;  %s1259_s18 = smov %s934_s19 }
 0x244   : > { %s1260_s19 = smov %s938_s20  ;;  %s1261_s20 = smov %s1114_s27 }
 0x245   : > { %s1262_s21 = smov %s1098_s29  ;;  %21 = sbr.rel (!%p19_p1) target bundleno = 6 (0x6), region = 93 }
 0x24c   :  { %506 = vsyncpa [#allocation3], 1 }
 0x24d   :  { %508 = vsyncpa [#allocation3 + $0x1], 1 }
 0x24e   :  { %509 = vsyncpa [#allocation6], 1 }
 0x24f   :  { %510 = vsyncpa [#allocation4], 1 }
 0x250   :  { %512 = vsyncpa [#allocation4 + $0x1], 1 }

</bundles_post_ra>
